<compile_context>
chip_gen: v6e
topology: v6e:2x2x1
jax: 0.10.0
libtpu: 0.0.40
codegen_flags: <defaults>
</compile_context>

<pallas_src>
import functools

import jax
import jax.numpy as jnp
from jax.experimental import pallas as pl
from jax.experimental.pallas import tpu as pltpu


# ---------------------------------------------------------------------------
# Fused kernel: one (batch n, head h) slice per grid step.
# ---------------------------------------------------------------------------
def _fused_attention_kernel(x_ref, wq_ref, wk_ref, wv_ref,
                            bq_ref, bk_ref, bv_ref,
                            wo_ref, bo_ref, o_ref):
    h = pl.program_id(1)
    last_h = pl.num_programs(1) - 1

    # dot_general dimension numbers (avoid explicit transposes / .T):
    c_last_first = (((1,), (0,)), ((), ()))   # (M,K) x (K,N) -> (M,N)
    c_last_last = (((1,), (1,)), ((), ()))    # (M,K) x (N,K) -> (M,N)

    x = x_ref[0]                                                    # (L, E)

    # Folded (outer Linear ∘ MHA in-proj) projections for this head; the
    # 1/sqrt(Dh) attention scale is already folded into wq/bq.
    q = jax.lax.dot_general(x, wq_ref[0], c_last_first,
                            preferred_element_type=jnp.float32) + bq_ref[0]
    k = jax.lax.dot_general(x, wk_ref[0], c_last_first,
                            preferred_element_type=jnp.float32) + bk_ref[0]
    v = jax.lax.dot_general(x, wv_ref[0], c_last_first,
                            preferred_element_type=jnp.float32) + bv_ref[0]

    # Attention for this (batch, head): scores, stable softmax (deferred norm).
    s = jax.lax.dot_general(q, k, c_last_last,
                            preferred_element_type=jnp.float32)     # (L, L)
    m = jnp.max(s, axis=-1, keepdims=True)
    p = jnp.exp(s - m)
    l = jnp.sum(p, axis=-1, keepdims=True)
    ctx = jax.lax.dot_general(p, v, c_last_first,
                              preferred_element_type=jnp.float32)   # (L, Dh)
    ctx = ctx * pl.reciprocal(l, approx=True)   # normalize the small tile (EUP)

    # Accumulate this head's slice of the output projection into the
    # batch-resident output block.
    @pl.when(h == 0)
    def _init():
        o_ref[...] = jnp.zeros_like(o_ref)

    o_ref[0] += jax.lax.dot_general(ctx, wo_ref[0], c_last_first,
                                    preferred_element_type=jnp.float32)

    @pl.when(h == last_h)
    def _finalize():
        o_ref[0] += bo_ref[...]                 # (1, E) broadcasts over (L, E)


# ---------------------------------------------------------------------------
# Wrapper: single pallas_call for the entire forward.
# ---------------------------------------------------------------------------
def attention_forward(x, fused, n_heads):
    """x: (L, N, E) float32 -> (L, N, E) float32."""
    L, N, E = x.shape
    H = n_heads
    Dh = E // H

    # Single layout change so (L, E) tiles are lane/sublane aligned per batch.
    xb = jnp.transpose(x, (1, 0, 2))            # (N, L, E)

    out_nle = pl.pallas_call(
        _fused_attention_kernel,
        out_shape=jax.ShapeDtypeStruct((N, L, E), jnp.float32),
        grid=(N, H),                            # head axis last = reduction axis
        in_specs=[
            pl.BlockSpec((1, L, E), lambda n, h: (n, 0, 0)),    # x (per batch)
            pl.BlockSpec((1, E, Dh), lambda n, h: (h, 0, 0)),   # wq (per head)
            pl.BlockSpec((1, E, Dh), lambda n, h: (h, 0, 0)),   # wk
            pl.BlockSpec((1, E, Dh), lambda n, h: (h, 0, 0)),   # wv
            pl.BlockSpec((1, 1, Dh), lambda n, h: (h, 0, 0)),   # bq
            pl.BlockSpec((1, 1, Dh), lambda n, h: (h, 0, 0)),   # bk
            pl.BlockSpec((1, 1, Dh), lambda n, h: (h, 0, 0)),   # bv
            pl.BlockSpec((1, Dh, E), lambda n, h: (h, 0, 0)),   # wo (per head)
            pl.BlockSpec((1, E), lambda n, h: (0, 0)),          # bo
        ],
        out_specs=pl.BlockSpec((1, L, E), lambda n, h: (n, 0, 0)),
        compiler_params=pltpu.CompilerParams(
            dimension_semantics=("parallel", "arbitrary")),
    )(xb, fused["wq"], fused["wk"], fused["wv"],
      fused["bq"], fused["bk"], fused["bv"], fused["wo"], fused["bo"])

    return jnp.transpose(out_nle, (1, 0, 2))    # back to (L, N, E)


# ---------------------------------------------------------------------------
# Parameters: PyTorch-layout init + one-time algebraic folding / head split.
# ---------------------------------------------------------------------------
def init_params(key, dim):
    def uni(k, shape, fan_in):
        bound = 1.0 / (fan_in ** 0.5)
        return jax.random.uniform(k, shape, jnp.float32, -bound, bound)

    keys = jax.random.split(key, 10)
    return {
        # outer q/k/v Linear(dim, dim), PyTorch (out_features, in_features)
        "q_w": uni(keys[0], (dim, dim), dim),
        "q_b": uni(keys[1], (dim,), dim),
        "k_w": uni(keys[2], (dim, dim), dim),
        "k_b": uni(keys[3], (dim,), dim),
        "v_w": uni(keys[4], (dim, dim), dim),
        "v_b": uni(keys[5], (dim,), dim),
        # nn.MultiheadAttention packed in-projection + out-projection
        "in_proj_w": uni(keys[6], (3 * dim, dim), dim),
        "in_proj_b": uni(keys[7], (3 * dim,), dim),
        "out_w": uni(keys[8], (dim, dim), dim),
        "out_b": uni(keys[9], (dim,), dim),
    }


def prepare_fused_params(params, n_heads):
    """Fold (outer Linear ∘ in_proj), fold the q scale, split weights per head."""
    E = params["q_w"].shape[0]
    H = n_heads
    Dh = E // H
    scale = 1.0 / (Dh ** 0.5)

    wq_in, wk_in, wv_in = jnp.split(params["in_proj_w"], 3, axis=0)
    bq_in, bk_in, bv_in = jnp.split(params["in_proj_b"], 3, axis=0)

    def compose(w_out, b_out, w_in, b_in, s):
        # (x @ w_out.T + b_out) @ w_in.T + b_in  ==  x @ W + b
        w = (w_in @ w_out).T * s                        # (E, E), x @ W layout
        b = (w_in @ b_out + b_in) * s                   # (E,)
        return (w.reshape(E, H, Dh).transpose(1, 0, 2), # (H, E, Dh)
                b.reshape(H, 1, Dh))                    # (H, 1, Dh)

    wq, bq = compose(params["q_w"], params["q_b"], wq_in, bq_in, scale)
    wk, bk = compose(params["k_w"], params["k_b"], wk_in, bk_in, 1.0)
    wv, bv = compose(params["v_w"], params["v_b"], wv_in, bv_in, 1.0)

    return {
        "wq": wq, "bq": bq, "wk": wk, "bk": bk, "wv": wv, "bv": bv,
        "wo": params["out_w"].T.reshape(H, Dh, E),      # rows = (head, dh)
        "bo": params["out_b"].reshape(1, E),
    }


# ---------------------------------------------------------------------------
# Pure-JAX reference (mirrors the PyTorch module step by step).
# ---------------------------------------------------------------------------
def attention_reference(x, params, n_heads):
    L, N, E = x.shape
    H = n_heads
    Dh = E // H

    def lin(t, w, b):
        return t @ w.T + b

    q = lin(x, params["q_w"], params["q_b"])
    k = lin(x, params["k_w"], params["k_b"])
    v = lin(x, params["v_w"], params["v_b"])

    wq_in, wk_in, wv_in = jnp.split(params["in_proj_w"], 3, axis=0)
    bq_in, bk_in, bv_in = jnp.split(params["in_proj_b"], 3, axis=0)
    q = lin(q, wq_in, bq_in) * (1.0 / (Dh ** 0.5))
    k = lin(k, wk_in, bk_in)
    v = lin(v, wv_in, bv_in)

    def heads(t):
        return t.reshape(L, N * H, Dh).transpose(1, 0, 2)   # (N*H, L, Dh)

    qh, kh, vh = heads(q), heads(k), heads(v)
    s = jnp.einsum("bqd,bkd->bqk", qh, kh)
    p = jax.nn.softmax(s, axis=-1)
    ctx = jnp.einsum("bqk,bkd->bqd", p, vh)
    o = ctx.transpose(1, 0, 2).reshape(L, N, E)
    return lin(o, params["out_w"], params["out_b"])


# ---------------------------------------------------------------------------
# Main
# ---------------------------------------------------------------------------
if __name__ == "__main__":
    dim = 32
    n_heads = 4
    seq_len = 8
    batch = 2

    key = jax.random.PRNGKey(0)
    kx, kp = jax.random.split(key)
    x = jax.random.normal(kx, (seq_len, batch, dim), jnp.float32)   # (L, N, E)
    params = init_params(kp, dim)
    fused = prepare_fused_params(params, n_heads)                   # one-time fold

    fwd = jax.jit(functools.partial(attention_forward, n_heads=n_heads))
    out = jax.block_until_ready(fwd(x, fused))

    assert out.shape == (seq_len, batch, dim), out.shape
    assert bool(jnp.all(jnp.isfinite(out)))

    ref = attention_reference(x, params, n_heads)
    err = float(jnp.max(jnp.abs(out - ref)))
    assert err < 2e-2, f"max abs error vs reference: {err}"

    print("KERNEL_OK")
</pallas_src>

<mosaic_0001>
module attributes {stable_mosaic.version = 11 : i64} {
  func.func @_fused_attention_kernel(%arg0: i32, %arg1: i32, %arg2: memref<1x8x32xf32, #tpu.memory_space<vmem>>, %arg3: memref<1x32x8xf32, #tpu.memory_space<vmem>>, %arg4: memref<1x32x8xf32, #tpu.memory_space<vmem>>, %arg5: memref<1x32x8xf32, #tpu.memory_space<vmem>>, %arg6: memref<1x1x8xf32, #tpu.memory_space<vmem>>, %arg7: memref<1x1x8xf32, #tpu.memory_space<vmem>>, %arg8: memref<1x1x8xf32, #tpu.memory_space<vmem>>, %arg9: memref<1x8x32xf32, #tpu.memory_space<vmem>>, %arg10: memref<1x32xf32, #tpu.memory_space<vmem>>, %arg11: memref<1x8x32xf32, #tpu.memory_space<vmem>>) attributes {dimension_semantics = [#tpu.dimension_semantics<parallel>, #tpu.dimension_semantics<arbitrary>], iteration_bounds = array<i64: 2, 4>, scalar_prefetch = 0 : i64, scratch_operands = 0 : i64, tpu.core_type = #tpu.core_type<tc>, window_params = [{transform_indices = @transform_0, window_bounds = array<i64: 1, 8, 32>}, {transform_indices = @transform_1, window_bounds = array<i64: 1, 32, 8>}, {transform_indices = @transform_2, window_bounds = array<i64: 1, 32, 8>}, {transform_indices = @transform_3, window_bounds = array<i64: 1, 32, 8>}, {transform_indices = @transform_4, window_bounds = array<i64: 1, 1, 8>}, {transform_indices = @transform_5, window_bounds = array<i64: 1, 1, 8>}, {transform_indices = @transform_6, window_bounds = array<i64: 1, 1, 8>}, {transform_indices = @transform_7, window_bounds = array<i64: 1, 8, 32>}, {pipeline_mode = #tpu.pipeline_mode<synchronous>, transform_indices = @transform_8, window_bounds = array<i64: 1, 32>}, {transform_indices = @transform_9, window_bounds = array<i64: 1, 8, 32>}]} {
    %c0 = arith.constant 0 : index
    %c0_0 = arith.constant 0 : index
    %c0_1 = arith.constant 0 : index
    %0 = vector.load %arg2[%c0, %c0_0, %c0_1] : memref<1x8x32xf32, #tpu.memory_space<vmem>>, vector<1x8x32xf32>
    %1 = vector.shape_cast %0 : vector<1x8x32xf32> to vector<8x32xf32>
    %c0_2 = arith.constant 0 : index
    %c0_3 = arith.constant 0 : index
    %c0_4 = arith.constant 0 : index
    %2 = vector.load %arg3[%c0_2, %c0_3, %c0_4] : memref<1x32x8xf32, #tpu.memory_space<vmem>>, vector<1x32x8xf32>
    %3 = vector.shape_cast %2 : vector<1x32x8xf32> to vector<32x8xf32>
    %cst = arith.constant dense<0.000000e+00> : vector<8x8xf32>
    %4 = tpu.matmul %1, %3, %cst {dimension_numbers = #tpu.dot_dimension_numbers<[1], [0], [0], [1], [0, 0, 1, 1], [], []>} : vector<8x32xf32>, vector<32x8xf32>, vector<8x8xf32> -> vector<8x8xf32>
    %c0_5 = arith.constant 0 : index
    %c0_6 = arith.constant 0 : index
    %c0_7 = arith.constant 0 : index
    %5 = vector.load %arg6[%c0_5, %c0_6, %c0_7] : memref<1x1x8xf32, #tpu.memory_space<vmem>>, vector<1x1x8xf32>
    %6 = vector.shape_cast %5 : vector<1x1x8xf32> to vector<1x8xf32>
    %7 = vector.broadcast %6 : vector<1x8xf32> to vector<8x8xf32>
    %8 = arith.addf %4, %7 : vector<8x8xf32>
    %c0_8 = arith.constant 0 : index
    %c0_9 = arith.constant 0 : index
    %c0_10 = arith.constant 0 : index
    %9 = vector.load %arg4[%c0_8, %c0_9, %c0_10] : memref<1x32x8xf32, #tpu.memory_space<vmem>>, vector<1x32x8xf32>
    %10 = vector.shape_cast %9 : vector<1x32x8xf32> to vector<32x8xf32>
    %cst_11 = arith.constant dense<0.000000e+00> : vector<8x8xf32>
    %11 = tpu.matmul %1, %10, %cst_11 {dimension_numbers = #tpu.dot_dimension_numbers<[1], [0], [0], [1], [0, 0, 1, 1], [], []>} : vector<8x32xf32>, vector<32x8xf32>, vector<8x8xf32> -> vector<8x8xf32>
    %c0_12 = arith.constant 0 : index
    %c0_13 = arith.constant 0 : index
    %c0_14 = arith.constant 0 : index
    %12 = vector.load %arg7[%c0_12, %c0_13, %c0_14] : memref<1x1x8xf32, #tpu.memory_space<vmem>>, vector<1x1x8xf32>
    %13 = vector.shape_cast %12 : vector<1x1x8xf32> to vector<1x8xf32>
    %14 = vector.broadcast %13 : vector<1x8xf32> to vector<8x8xf32>
    %15 = arith.addf %11, %14 : vector<8x8xf32>
    %c0_15 = arith.constant 0 : index
    %c0_16 = arith.constant 0 : index
    %c0_17 = arith.constant 0 : index
    %16 = vector.load %arg5[%c0_15, %c0_16, %c0_17] : memref<1x32x8xf32, #tpu.memory_space<vmem>>, vector<1x32x8xf32>
    %17 = vector.shape_cast %16 : vector<1x32x8xf32> to vector<32x8xf32>
    %cst_18 = arith.constant dense<0.000000e+00> : vector<8x8xf32>
    %18 = tpu.matmul %1, %17, %cst_18 {dimension_numbers = #tpu.dot_dimension_numbers<[1], [0], [0], [1], [0, 0, 1, 1], [], []>} : vector<8x32xf32>, vector<32x8xf32>, vector<8x8xf32> -> vector<8x8xf32>
    %c0_19 = arith.constant 0 : index
    %c0_20 = arith.constant 0 : index
    %c0_21 = arith.constant 0 : index
    %19 = vector.load %arg8[%c0_19, %c0_20, %c0_21] : memref<1x1x8xf32, #tpu.memory_space<vmem>>, vector<1x1x8xf32>
    %20 = vector.shape_cast %19 : vector<1x1x8xf32> to vector<1x8xf32>
    %21 = vector.broadcast %20 : vector<1x8xf32> to vector<8x8xf32>
    %22 = arith.addf %18, %21 : vector<8x8xf32>
    %cst_22 = arith.constant dense<0.000000e+00> : vector<8x8xf32>
    %23 = tpu.matmul %8, %15, %cst_22 {dimension_numbers = #tpu.dot_dimension_numbers<[1], [1], [0], [0], [0, 0, 1, 0], [], []>} : vector<8x8xf32>, vector<8x8xf32>, vector<8x8xf32> -> vector<8x8xf32>
    %cst_23 = arith.constant dense<0xFF800000> : vector<8xf32>
    %24 = vector.multi_reduction <maximumf>, %23, %cst_23 [1] : vector<8x8xf32> to vector<8xf32>
    %25 = vector.shape_cast %24 : vector<8xf32> to vector<8x1xf32>
    %26 = vector.broadcast %25 : vector<8x1xf32> to vector<8x8xf32>
    %27 = arith.subf %23, %26 : vector<8x8xf32>
    %28 = math.exp %27 : vector<8x8xf32>
    %cst_24 = arith.constant dense<0.000000e+00> : vector<8xf32>
    %29 = vector.multi_reduction <add>, %28, %cst_24 [1] : vector<8x8xf32> to vector<8xf32>
    %30 = vector.shape_cast %29 : vector<8xf32> to vector<8x1xf32>
    %cst_25 = arith.constant dense<0.000000e+00> : vector<8x8xf32>
    %31 = tpu.matmul %28, %22, %cst_25 {dimension_numbers = #tpu.dot_dimension_numbers<[1], [0], [0], [1], [0, 0, 1, 1], [], []>} : vector<8x8xf32>, vector<8x8xf32>, vector<8x8xf32> -> vector<8x8xf32>
    %32 = tpu.reciprocal %30 {approx = true} : vector<8x1xf32> -> vector<8x1xf32>
    %33 = vector.broadcast %32 : vector<8x1xf32> to vector<8x8xf32>
    %34 = arith.mulf %31, %33 : vector<8x8xf32>
    %c0_i32 = arith.constant 0 : i32
    %35 = arith.cmpi eq, %arg1, %c0_i32 : i32
    %36 = arith.extui %35 : i1 to i32
    %c0_i32_26 = arith.constant 0 : i32
    %37 = arith.cmpi ne, %36, %c0_i32_26 : i32
    scf.if %37 {
      %cst_38 = arith.constant 0.000000e+00 : f32
      %50 = vector.broadcast %cst_38 : f32 to vector<1x8x32xf32>
      %c0_39 = arith.constant 0 : index
      %c0_40 = arith.constant 0 : index
      %c0_41 = arith.constant 0 : index
      %51 = vector.load %arg11[%c0_39, %c0_40, %c0_41] : memref<1x8x32xf32, #tpu.memory_space<vmem>>, vector<1x8x32xf32>
      tpu.vector_store %arg11[%c0_39, %c0_40, %c0_41], %50 {strides = array<i32>} : memref<1x8x32xf32, #tpu.memory_space<vmem>>, vector<1x8x32xf32>,
    } else {
    }
    %c0_27 = arith.constant 0 : index
    %c0_28 = arith.constant 0 : index
    %c0_29 = arith.constant 0 : index
    %38 = vector.load %arg11[%c0_27, %c0_28, %c0_29] : memref<1x8x32xf32, #tpu.memory_space<vmem>>, vector<1x8x32xf32>
    %39 = vector.shape_cast %38 : vector<1x8x32xf32> to vector<8x32xf32>
    %c0_30 = arith.constant 0 : index
    %c0_31 = arith.constant 0 : index
    %c0_32 = arith.constant 0 : index
    %40 = vector.load %arg9[%c0_30, %c0_31, %c0_32] : memref<1x8x32xf32, #tpu.memory_space<vmem>>, vector<1x8x32xf32>
    %41 = vector.shape_cast %40 : vector<1x8x32xf32> to vector<8x32xf32>
    %cst_33 = arith.constant dense<0.000000e+00> : vector<8x32xf32>
    %42 = tpu.matmul %34, %41, %cst_33 {dimension_numbers = #tpu.dot_dimension_numbers<[1], [0], [0], [1], [0, 0, 1, 1], [], []>} : vector<8x8xf32>, vector<8x32xf32>, vector<8x32xf32> -> vector<8x32xf32>
    %43 = arith.addf %39, %42 : vector<8x32xf32>
    %c0_34 = arith.constant 0 : index
    %c0_35 = arith.constant 0 : index
    %c0_36 = arith.constant 0 : index
    %44 = vector.load %arg11[%c0_34, %c0_35, %c0_36] : memref<1x8x32xf32, #tpu.memory_space<vmem>>, vector<1x8x32xf32>
    %45 = vector.shape_cast %44 : vector<1x8x32xf32> to vector<8x32xf32>
    %46 = vector.shape_cast %43 : vector<8x32xf32> to vector<1x8x32xf32>
    tpu.vector_store %arg11[%c0_34, %c0_35, %c0_36], %46 {strides = array<i32>} : memref<1x8x32xf32, #tpu.memory_space<vmem>>, vector<1x8x32xf32>,
    %c3_i32 = arith.constant 3 : i32
    %47 = arith.cmpi eq, %arg1, %c3_i32 : i32
    %48 = arith.extui %47 : i1 to i32
    %c0_i32_37 = arith.constant 0 : i32
    %49 = arith.cmpi ne, %48, %c0_i32_37 : i32
    scf.if %49 {
      %c0_38 = arith.constant 0 : index
      %c0_39 = arith.constant 0 : index
      %c0_40 = arith.constant 0 : index
      %50 = vector.load %arg11[%c0_38, %c0_39, %c0_40] : memref<1x8x32xf32, #tpu.memory_space<vmem>>, vector<1x8x32xf32>
      %51 = vector.shape_cast %50 : vector<1x8x32xf32> to vector<8x32xf32>
      %c0_41 = arith.constant 0 : index
      %c0_42 = arith.constant 0 : index
      %52 = vector.load %arg10[%c0_41, %c0_42] : memref<1x32xf32, #tpu.memory_space<vmem>>, vector<1x32xf32>
      %53 = vector.broadcast %52 : vector<1x32xf32> to vector<8x32xf32>
      %54 = arith.addf %51, %53 : vector<8x32xf32>
      %c0_43 = arith.constant 0 : index
      %c0_44 = arith.constant 0 : index
      %c0_45 = arith.constant 0 : index
      %55 = vector.load %arg11[%c0_43, %c0_44, %c0_45] : memref<1x8x32xf32, #tpu.memory_space<vmem>>, vector<1x8x32xf32>
      %56 = vector.shape_cast %55 : vector<1x8x32xf32> to vector<8x32xf32>
      %57 = vector.shape_cast %54 : vector<8x32xf32> to vector<1x8x32xf32>
      tpu.vector_store %arg11[%c0_43, %c0_44, %c0_45], %57 {strides = array<i32>} : memref<1x8x32xf32, #tpu.memory_space<vmem>>, vector<1x8x32xf32>,
    } else {
    }
    return
  }
  func.func @transform_0(%arg0: i32, %arg1: i32) -> (i32, i32, i32) {
    %c0_i32 = arith.constant 0 : i32
    %c0_i32_0 = arith.constant 0 : i32
    %c0_i32_1 = arith.constant 0 : i32
    return %arg0, %c0_i32, %c0_i32_0 : i32, i32, i32
  }
  func.func @transform_1(%arg0: i32, %arg1: i32) -> (i32, i32, i32) {
    %c0_i32 = arith.constant 0 : i32
    %c0_i32_0 = arith.constant 0 : i32
    %c0_i32_1 = arith.constant 0 : i32
    return %arg1, %c0_i32, %c0_i32_0 : i32, i32, i32
  }
  func.func @transform_2(%arg0: i32, %arg1: i32) -> (i32, i32, i32) {
    %c0_i32 = arith.constant 0 : i32
    %c0_i32_0 = arith.constant 0 : i32
    %c0_i32_1 = arith.constant 0 : i32
    return %arg1, %c0_i32, %c0_i32_0 : i32, i32, i32
  }
  func.func @transform_3(%arg0: i32, %arg1: i32) -> (i32, i32, i32) {
    %c0_i32 = arith.constant 0 : i32
    %c0_i32_0 = arith.constant 0 : i32
    %c0_i32_1 = arith.constant 0 : i32
    return %arg1, %c0_i32, %c0_i32_0 : i32, i32, i32
  }
  func.func @transform_4(%arg0: i32, %arg1: i32) -> (i32, i32, i32) {
    %c0_i32 = arith.constant 0 : i32
    %c0_i32_0 = arith.constant 0 : i32
    %c0_i32_1 = arith.constant 0 : i32
    return %arg1, %c0_i32, %c0_i32_0 : i32, i32, i32
  }
  func.func @transform_5(%arg0: i32, %arg1: i32) -> (i32, i32, i32) {
    %c0_i32 = arith.constant 0 : i32
    %c0_i32_0 = arith.constant 0 : i32
    %c0_i32_1 = arith.constant 0 : i32
    return %arg1, %c0_i32, %c0_i32_0 : i32, i32, i32
  }
  func.func @transform_6(%arg0: i32, %arg1: i32) -> (i32, i32, i32) {
    %c0_i32 = arith.constant 0 : i32
    %c0_i32_0 = arith.constant 0 : i32
    %c0_i32_1 = arith.constant 0 : i32
    return %arg1, %c0_i32, %c0_i32_0 : i32, i32, i32
  }
  func.func @transform_7(%arg0: i32, %arg1: i32) -> (i32, i32, i32) {
    %c0_i32 = arith.constant 0 : i32
    %c0_i32_0 = arith.constant 0 : i32
    %c0_i32_1 = arith.constant 0 : i32
    return %arg1, %c0_i32, %c0_i32_0 : i32, i32, i32
  }
  func.func @transform_8(%arg0: i32, %arg1: i32) -> (i32, i32) {
    %c0_i32 = arith.constant 0 : i32
    %c0_i32_0 = arith.constant 0 : i32
    %c0_i32_1 = arith.constant 0 : i32
    return %c0_i32, %c0_i32_0 : i32, i32
  }
  func.func @transform_9(%arg0: i32, %arg1: i32) -> (i32, i32, i32) {
    %c0_i32 = arith.constant 0 : i32
    %c0_i32_0 = arith.constant 0 : i32
    %c0_i32_1 = arith.constant 0 : i32
    return %arg0, %c0_i32, %c0_i32_0 : i32, i32, i32
  }
}

</mosaic_0001>

<bundles_post_ra>
// kernel: attention_forward.1
= control target key start
LH: loop header
LB: loop body
LE: loop exit
PB: predicated region body
PF: predicated region fallthrough
CT: control target
= control target key end

     0   :  { %s1344_s30 = smov 0   ;;  %s1346_s10 = smov 0   ;;  %s1486_s0 = inlined_call_operand.vmem [shape: f32[2,8,32], index: 0, kind: input, shape index: {}]   ;;  %s1487_s1 = inlined_call_operand.vmem [shape: f32[4,32,8], index: 1, kind: input, shape index: {}]   ;;  %s1488_s2 = inlined_call_operand.vmem [shape: f32[4,32,8], index: 2, kind: input, shape index: {}]   ;;  %s1489_s3 = inlined_call_operand.vmem [shape: f32[4,32,8], index: 3, kind: input, shape index: {}]   ;;  %s1490_s4 = inlined_call_operand.vmem [shape: f32[4,1,8], index: 4, kind: input, shape index: {}]   ;;  %s1491_s5 = inlined_call_operand.vmem [shape: f32[4,1,8], index: 5, kind: input, shape index: {}]   ;;  %s1492_s6 = inlined_call_operand.vmem [shape: f32[4,1,8], index: 6, kind: input, shape index: {}]   ;;  %s1493_s7 = inlined_call_operand.vmem [shape: f32[4,8,32], index: 7, kind: input, shape index: {}]   ;;  %s1494_s8 = inlined_call_operand.vmem [shape: f32[1,32], index: 8, kind: input, shape index: {}]   ;;  %s1495_s9 = inlined_call_operand.vmem [shape: f32[2,8,32], index: 9, kind: output, shape index: {}]  }
   0x1   :  { %s1348_s11 = smov 0   ;;  %s1350_s12 = smov 0  }
   0x2   :  { %s1352_s13 = smov 0  }
   0x3 LB: > { %s28_s14 = sadd.s32 1, %s1281_s11  ;;  %s31_s15 = sadd.s32 1, %s1285_s12  ;;  %s1289_s13 = sphi %s1352_s13, %s19_s13   ;;  %s1285_s12 = sphi %s1350_s12, %s1501_s12   ;;  %s1281_s11 = sphi %s1348_s11, %s1500_s11   ;;  %s1277_s10 = sphi %s1346_s10, %s1499_s10   ;;  %s1273_s30 = sphi %s1344_s30, %s1498_s30  }
   0x4   : > { %p29_p0 = scmp.ge.s32.totalorder %s28_s14, 4  ;;  %p1107_p1 = scmp.ge.s32.totalorder %s1289_s13, 1 }
   0x5   : > { %p361_p2 = scmp.lt.s32.totalorder %s1289_s13, 9 }
   0x6   : > { %s1503_s14 = smov (%p29_p0, %s28_s14), 0  ;;  %s1505_s15 = smov (!%p29_p0, %s31_s15), %s1285_s12 }
   0x7   : > { %p362_p3 = pnand %p1107_p1, %p361_p2  ;;  %p33_p4 = scmp.ge.s32.totalorder %s1505_s15, 2 }
   0x8   : > { %p427_p5 = scmp.lt.s32.totalorder (!%p362_p3), %s1273_s30, 3  ;;  %p423_p6 = scmp.lt.s32.totalorder (!%p362_p3), %s1277_s10, 1 }
   0x9   : > { %s1507_s15 = smov (%p33_p4, %s1505_s15), 0  ;;  %365 = sbr.rel (%p362_p3) target bundleno = 979 (0x3d3), region = 56 }
   0xa   : > { %1496 = sst [smem:[#allocation2_spill]] %s1507_s15  ;;  %p1126_p7 = scmp.ne.s32.totalorder (!%p362_p3), %s1273_s30, 0 }
   0xe   : > { %v1291_v0 = vmov 0.0   ;;  %s1380_s16 = scalar_select %p427_p5, %s1273_s30, 3  ;;  %vm1292_vm0 = vmmov 0   ;;  %vm471_vm1 = vcmask 261120   ;;  %vm707_vm2 = vcmask 64512  }
   0xf   : > { %1167 = vmatprep.subr.mxu1 %v1291_v0  ;;  %1156 = vmatprep.subr.mxu0 %v1291_v0  ;;  %s1509_s10 = smov (!%p423_p6, %s1277_s10), 1 }
  0x10   : > { %1175 = vmatprep.mubr.msk.f32.mxu1 %vm1292_vm0, %v1291_v0  ;;  %1164 = vmatprep.mubr.msk.f32.mxu0 %vm1292_vm0, %v1291_v0  ;;  %s1387_s17 = sshll.u32 %s1380_s16, 5  ;;  %s1115_s18 = sshll.u32 %s1380_s16, 3 }
  0x11   : > { %s436_s21 = scalar_lea.vmem %s1488_s2, %s1387_s17  ;;  %s1397_s24 = scalar_lea.vmem %s1493_s7, %s1115_s18 }
  0x12   : > { %v548_v1 = vld [vmem:[%s436_s21 + $0x18] sm:$0xff]  ;;  %s431_s27 = scalar_lea.vmem %s1487_s1, %s1387_s17  ;;  %v547_v2 = vld [vmem:[%s436_s21 + $0x10] sm:$0xff]  ;;  %s1108_s28 = sshll.u32 %s1509_s10, 3  ;;  %v546_v5 = vld [vmem:[%s436_s21 + $0x8] sm:$0xff] }
  0x13   : > { %1168 = vmatpush3.msra.mxu1 %v548_v1  ;;  %v463_v3 = vld [vmem:[%s431_s27 + $0x18] sm:$0xff]  ;;  %v462_v4 = vld [vmem:[%s431_s27 + $0x10] sm:$0xff]  ;;  %s1406_s19 = scalar_lea.vmem %s1495_s9, %s1108_s28  ;;  %s426_s22 = scalar_lea.vmem %s1486_s0, %s1108_s28  ;;  %v461_v6 = vld [vmem:[%s431_s27 + $0x8] sm:$0xff] }
  0x14   : > { %1169 = vmatprep.subr.mxu1 %v1291_v0  ;;  %1157 = vmatpush3.msra.mxu0 %v463_v3  ;;  %v545_v7 = vld [vmem:[%s436_s21] sm:$0xff]  ;;  %s441_s21 = scalar_lea.vmem %s1489_s3, %s1387_s17  ;;  %s447_s17 = scalar_lea.vmem %s1491_s5, %s1380_s16 }
  0x15   : > { %1170 = vmatpush3.msra.mxu1 %v547_v2  ;;  %1158 = vmatprep.subr.mxu0 %v1291_v0  ;;  %v459_v8 = vld [vmem:[%s426_s22] sm:$0xff]  ;;  %v629_v10 = vld [vmem:[%s441_s21 + $0x18] sm:$0xff]  ;;  %v628_v11 = vld [vmem:[%s441_s21 + $0x10] sm:$0xff]  ;;  %s444_s28 = scalar_lea.vmem %s1490_s4, %s1380_s16  ;;  %s450_s20 = scalar_lea.vmem %s1492_s6, %s1380_s16 }
  0x16   : > { %1171 = vmatprep.subr.mxu1 %v1291_v0  ;;  %1159 = vmatpush3.msra.mxu0 %v462_v4  ;;  %v460_v9 = vld [vmem:[%s431_s27] sm:$0xff]  ;;  %v627_v12 = vld [vmem:[%s441_s21 + $0x8] sm:$0xff] }
  0x17   : > { %1172 = vmatpush3.msra.mxu1 %v546_v5  ;;  %1160 = vmatprep.subr.mxu0 %v1291_v0  ;;  %v626_v13 = vld [vmem:[%s441_s21] sm:$0xff] }
  0x18   : > { %1173 = vmatprep.subr.mxu1 %v1291_v0  ;;  %1161 = vmatpush3.msra.mxu0 %v461_v6  ;;  %v1119_v14 = vld [vmem:[%s447_s17] ss:$0 sm:$0xff] }
  0x19   : > { %1174 = vmatpush3.msra.mxu1 %v545_v7  ;;  %1162 = vmatprep.subr.mxu0 %v1291_v0  ;;  %v1117_v15 = vld [vmem:[%s444_s28] ss:$0 sm:$0xff] }
  0x1a   : > { %1176 = vmatmul.mubr.msk.f32.vlgmr.msra.gmra.mxu1 %vm471_vm1, %v459_v8  ;;  %1163 = vmatpush3.msra.mxu0 %v460_v9  ;;  %v1121_v26 = vld [vmem:[%s450_s20] ss:$0 sm:$0xff] }
  0x1b   : > { %1165 = vmatmul.mubr.msk.f32.vlgmr.msra.gmra.mxu0 %vm471_vm1, %v459_v8  ;;  %1189 = vmatprep.subr.mxu1 %v1291_v0 }
  0x1c   : > { %1191 = vmatprep.mubr.msk.f32.mxu1 %vm1292_vm0, %v1291_v0  ;;  %1178 = vmatprep.subr.mxu0 %v1291_v0 }
  0x1d   : > { %1186 = vmatprep.mubr.msk.f32.mxu0 %vm1292_vm0, %v1291_v0  ;;  %1179 = vmatpush3.msra.mxu0 %v629_v10 }
  0x1e   : > { %1180 = vmatprep.subr.mxu0 %v1291_v0 }
  0x1f   : > { %1181 = vmatpush3.msra.mxu0 %v628_v11 }
  0x20   : > { %1182 = vmatprep.subr.mxu0 %v1291_v0 }
  0x21   : > { %1183 = vmatpush3.msra.mxu0 %v627_v12 }
  0x22   : > { %1184 = vmatprep.subr.mxu0 %v1291_v0 }
  0x23   : > { %1185 = vmatpush3.msra.mxu0 %v626_v13 }
  0x24   : > { %1187 = vmatmul.mubr.msk.f32.vlgmr.msra.gmra.mxu0 %vm471_vm1, %v459_v8 }
  0xda   : > { %v622_v16 = vpop.f32.mrf.mxu1 }
  0xdb   : > { %v623_v17 = vadd.f32 %v1119_v14, %v622_v16  ;;  %v541_v18 = vpop.f32.mrf.mxu0 }
  0xdc   : > { %v542_v19 = vadd.f32 %v1117_v15, %v541_v18  ;;  %v1177_v20 = vpop.f32.mrf.mxu1 }
  0xdd   : > { %1190 = vmatpush3.xpose.msk.msra.mxu1 %vm707_vm2, %v623_v17  ;;  %v1166_v21 = vpop.f32.mrf.mxu0 }
  0xde   : > { %1194 = vmatprep.subr.mxu1 %v1291_v0 }
  0xe0   : > { %1192 = vmatmul.mubr.msk.f32.vlgmr.msra.gmra.mxu1 %vm707_vm2, %v542_v19 }
  0xe1   : > { %1196 = vmatprep.mubr.msk.f32.mxu1 %vm1292_vm0, %v1291_v0 }
  0xe4   : > { %v703_v25 = vpop.f32.mrf.mxu0 }
  0xe5   : > { %v704_v27 = vadd.f32 %v1121_v26, %v703_v25 }
  0xe6   : > { %v1188_v28 = vpop.f32.mrf.mxu0 }
  0xe7   : > { %1195 = vmatpush3.msra.mxu1 %v704_v27 }
 0x1a0   : > { %v780_v22 = vpop.f32.mrf.mxu1 }
 0x1a1   : > { %v784_v23 = vsel %vm707_vm2, %v780_v22, -inf }
 0x1a2   : > { %785 = vmax.xlane.f32.xlu0 %v784_v23  ;;  %v1193_v24 = vpop.f32.mrf.mxu1 }
 0x22b   : > { %v786_v29 = vpop.xlane.xlu0 %785 }
 0x22c   : > { %v787_v30 = vsub.f32 %v780_v22, %v786_v29 }
 0x22e   : > { %v788_v31 = vmul.f32 1.442695, %v787_v30 }
 0x230   : > { %1247 = vpow2.f32 %v788_v31 }
 0x23d   : > { %v1248_v32 = vpop.eup %1247 }
 0x23e   : > { %1197 = vmatmul.mubr.msk.f32.vlgmr.msra.gmra.mxu1 %vm707_vm2, %v1248_v32  ;;  %v790_v33 = vsel %vm707_vm2, %v1248_v32, 0.0 }
 0x23f   : > { %791 = vadd.xlane.f32.xlu0 %v790_v33 }
 0x2c8   : > { %v792_v34 = vpop.xlane.xlu0 %791 }
 0x2c9   : > { %1249 = vrcp.f32 %v792_v34 }
 0x2d6   : > { %v1250_v35 = vpop.eup %1249 }
 0x2fc   : > { %871 = sbr.rel (%p1126_p7) target bundleno = 771 (0x303), region = 60 }
 0x2fe   : > { %v862_v36 = vpop.f32.mrf.mxu1 }
 0x2ff   : > { %v867_v37 = vmul.f32 %v1250_v35, %v862_v36 }
 0x300   : > { %v1198_v38 = vpop.f32.mrf.mxu1 }
 0x301   : > { %v1293_v39 = vmov 0.0  }
 0x302   : > { %872 = vst.msk [vmem:[%s1406_s19] sm:$0xff] %vm471_vm1, %v1293_v39 }
 0x303 PF: > { %1199 = vmatprep.subr.mxu0 %v1291_v0  ;;  %v874_v40 = vld [vmem:[%s1397_s24] sm:$0xff]  ;;  %1201 = vmatprep.mubr.msk.f32.mxu0 %vm1292_vm0, %v1291_v0  ;;  %p1128_p8 = scmp.ne.s32.totalorder %s1273_s30, 3 }
 0x304   : > { %1200 = vmatpush3.msra.mxu0 %v874_v40 }
 0x305   : > { %1202 = vmatmul.mubr.msk.f32.vlgmr.msra.gmra.mxu0 %vm707_vm2, %v867_v37 }
 0x309   : > { %v873_v41 = vld [vmem:[%s1406_s19] sm:$0xff] }
 0x3c4   : > { %953 = sbr.rel (%p1128_p8) target bundleno = 979 (0x3d3), region = 64 }
 0x3c5   : > { %v944_v42 = vpop.f32.mrf.mxu0 }
 0x3c6   : > { %v948_v43 = vadd.f32 %v944_v42, %v873_v41 }
 0x3c7   : > { %v1203_v44 = vpop.f32.mrf.mxu0 }
 0x3c8   : > { %949 = vst.msk [vmem:[%s1406_s19] sm:$0xff] %vm471_vm1, %v948_v43 }
 0x3c9   : > { %v1129_v46 = vld [vmem:[%s1494_s8] ss:$0 sm:$0xff] }
 0x3cf   : > { %v954_v45 = vld [vmem:[%s1406_s19] sm:$0xff] }
 0x3d0   : > { %v962_v47 = vadd.f32 %v1129_v46, %v954_v45 }
 0x3d2   : > { %963 = vst.msk [vmem:[%s1406_s19] sm:$0xff] %vm471_vm1, %v962_v47 }
 0x3d3 PF: > { %s19_s13 = sadd.s32 1, %s1289_s13   ;;  %s1497_s22 = sld [smem:[#allocation2_spill]] }
 0x3d4   : > { %p16_p9 = scmp.ge.s32.totalorder %s19_s13, 10   ;;  %s1498_s30 = smov %s1281_s11 }
 0x3d5   : > { %s1499_s10 = smov %s1285_s12  ;;  %s1500_s11 = smov %s1503_s14 }
 0x3d6   :  { %18 = sbr.rel (!%p16_p9) target bundleno = 3 (0x3), region = 115 }
 0x3d9   : > { %s1501_s12 = smov %s1497_s22 }

</bundles_post_ra>
